<compile_context>
chip_gen: v7x
topology: tpu7x:2x2x1
jax: 0.10.0
libtpu: 0.0.40
codegen_flags: <defaults>
</compile_context>

<pallas_src>
from functools import partial

import jax
import jax.numpy as jnp
from jax.experimental import pallas as pl
from jax.experimental.pallas import tpu as pltpu


def _round_up(x, m):
    return (x + m - 1) // m * m


def qnn_kernel(x_ref, w1_ref, b1_ref, w2_ref, b2_ref, out_ref):
    # Hot path, all VMEM-resident:
    #   in-kernel cast (VPU, hidden under DMA) -> matmul (MXU, f32 acc)
    #   -> bias + tanh in f32 (VPU/EUP; v5e-safe) -> matmul (MXU, f32)
    #   -> bias -> store true-width output tile (masked vst, no padding).
    x = x_ref[...].astype(w1_ref.dtype)
    h = jnp.dot(x, w1_ref[...], preferred_element_type=jnp.float32)
    h = jnp.tanh(h + b1_ref[...])                      # (TB, n2p) + (1, n2p), f32
    y = jnp.dot(h, w2_ref[...].astype(jnp.float32),
                preferred_element_type=jnp.float32)
    out_ref[...] = (y + b2_ref[...]).astype(out_ref.dtype)


def prepare_qnn_params(w1, b1, w2, b2, *, use_bf16=False):
    """One-time parameter prep (call OUTSIDE the rollout loop).

    Pads the hidden dim to a lane-dense multiple of 128 (zero padding is
    mathematically inert: padded hidden units get bias 0 -> tanh(0)=0 and hit
    zero rows of w2) and casts weights for the MXU. Biases stay f32.
    Weights are stored (in, out), i.e. PyTorch weight.T, so the math is
    y = tanh(x @ w1 + b1) @ w2 + b2 — identical to the nn.Module forward.
    """
    n1, n2 = w1.shape
    n3 = w2.shape[1]
    n2p = _round_up(n2, 128)
    wdt = jnp.bfloat16 if use_bf16 else w1.dtype
    w1p = jnp.zeros((n1, n2p), wdt).at[:, :n2].set(w1.astype(wdt))
    b1p = jnp.zeros((1, n2p), jnp.float32).at[0, :n2].set(b1.astype(jnp.float32))
    w2p = jnp.zeros((n2p, n3), wdt).at[:n2, :].set(w2.astype(wdt))
    b2p = b2.astype(jnp.float32).reshape(1, n3)
    return w1p, b1p, w2p, b2p


@partial(jax.jit, static_argnames=("tile_b",))
def qnn_forward(x, w1p, b1p, w2p, b2p, *, tile_b=None):
    """Fused QNN forward: y = tanh(x @ w1 + b1) @ w2 + b2.

    x : (B, n1) f32 (or bf16); prepared params from prepare_qnn_params().
    """
    B, n1 = x.shape
    n2p = w1p.shape[1]
    n3 = w2p.shape[1]
    out_dtype = x.dtype
    SUB = 8  # f32 sublane granularity for the x / out batch tiles

    if tile_b is None:
        # Large tiles to amortize the ~0.35 us per-grid-step overhead, but keep
        # >= ~4 grid steps when B allows so the "parallel" batch axis is split
        # across both v7x TensorCores.
        tile_b = min(2048, _round_up(max(pl.cdiv(B, 4), SUB), SUB))
    tile_b = max(SUB, _round_up(int(tile_b), SUB))

    grid = (pl.cdiv(B, tile_b),)  # ragged last tile is masked by Pallas

    return pl.pallas_call(
        qnn_kernel,
        out_shape=jax.ShapeDtypeStruct((B, n3), out_dtype),
        grid_spec=pltpu.PrefetchScalarGridSpec(
            num_scalar_prefetch=0,
            grid=grid,
            in_specs=[
                # x tiles stream over the batch axis (double-buffered by Pallas)
                pl.BlockSpec((tile_b, n1), lambda i: (i, 0)),
                # weights / biases: constant index_map -> VMEM-resident, DMA'd once
                pl.BlockSpec((n1, n2p), lambda i: (0, 0)),
                pl.BlockSpec((1, n2p), lambda i: (0, 0)),
                pl.BlockSpec((n2p, n3), lambda i: (0, 0)),
                pl.BlockSpec((1, n3), lambda i: (0, 0)),
            ],
            # True output width n3 (== full array dim): masked vst beats 32x
            # write amplification from padding n3 to 128.
            out_specs=pl.BlockSpec((tile_b, n3), lambda i: (i, 0)),
        ),
        compiler_params=pltpu.CompilerParams(
            dimension_semantics=("parallel",),  # shard batch across TCs on v7x
        ),
    )(x, w1p, b1p, w2p, b2p)


def init_qnn_params(key, n1, n2, n3, dtype=jnp.float32):
    """Deterministic init mirroring nn.Linear default (U[-1/sqrt(fan_in), +...])."""
    k1, k2, k3, k4 = jax.random.split(key, 4)
    bound1 = 1.0 / jnp.sqrt(jnp.array(n1, dtype))
    bound2 = 1.0 / jnp.sqrt(jnp.array(n2, dtype))
    # Stored as (in, out), i.e. PyTorch weight.T
    w1 = jax.random.uniform(k1, (n1, n2), dtype, -bound1, bound1)
    b1 = jax.random.uniform(k2, (n2,), dtype, -bound1, bound1)
    w2 = jax.random.uniform(k3, (n2, n3), dtype, -bound2, bound2)
    b2 = jax.random.uniform(k4, (n3,), dtype, -bound2, bound2)
    return w1, b1, w2, b2


if __name__ == "__main__":
    # FrozenLake-ish Q-network shapes: 16 states (one-hot) -> 32 hidden -> 4 actions.
    B, n1, n2, n3 = 8, 16, 32, 4

    key = jax.random.PRNGKey(0)
    kx, kp, kbig = jax.random.split(key, 3)
    x = jax.random.normal(kx, (B, n1), jnp.float32)
    w1, b1, w2, b2 = init_qnn_params(kp, n1, n2, n3)

    # Parameters prepared ONCE (outside any rollout / training loop).
    params_f32 = prepare_qnn_params(w1, b1, w2, b2, use_bf16=False)

    # Small-batch path (single grid step).
    out = jax.block_until_ready(qnn_forward(x, *params_f32))
    ref = jnp.tanh(x @ w1 + b1) @ w2 + b2
    assert out.shape == (B, n3)
    assert jnp.allclose(out, ref, atol=1e-5, rtol=1e-5), "mismatch vs reference (small)"

    # Batched path: many rollout steps / envs folded into ONE pallas_call,
    # exercising multiple grid steps + resident weights + pipelining.
    b_big = 1024
    xb = jax.random.normal(kbig, (b_big, n1), jnp.float32)
    refb = jnp.tanh(xb @ w1 + b1) @ w2 + b2

    outb = jax.block_until_ready(qnn_forward(xb, *params_f32))
    assert outb.shape == (b_big, n3)
    assert jnp.allclose(outb, refb, atol=1e-5, rtol=1e-5), "mismatch vs reference (batched)"

    # bf16 MXU path (v6e/v7x fast path): weights pre-cast once, x cast in-kernel,
    # f32 accumulation + f32 tanh/bias epilogue.
    params_bf16 = prepare_qnn_params(w1, b1, w2, b2, use_bf16=True)
    outbf = jax.block_until_ready(qnn_forward(xb, *params_bf16))
    assert outbf.shape == (b_big, n3)
    assert jnp.allclose(outbf, refb, atol=5e-2, rtol=5e-2), "mismatch vs reference (bf16)"

    print("KERNEL_OK")
</pallas_src>

<mosaic_0001>
module attributes {stable_mosaic.version = 11 : i64} {
  func.func @qnn_kernel(%arg0: i32, %arg1: memref<8x16xf32, #tpu.memory_space<vmem>>, %arg2: memref<16x128xf32, #tpu.memory_space<vmem>>, %arg3: memref<1x128xf32, #tpu.memory_space<vmem>>, %arg4: memref<128x4xf32, #tpu.memory_space<vmem>>, %arg5: memref<1x4xf32, #tpu.memory_space<vmem>>, %arg6: memref<8x4xf32, #tpu.memory_space<vmem>>) attributes {dimension_semantics = [#tpu.dimension_semantics<parallel>], iteration_bounds = array<i64: 1>, scalar_prefetch = 0 : i64, scratch_operands = 0 : i64, tpu.core_type = #tpu.core_type<tc>, window_params = [{transform_indices = @transform_0, window_bounds = array<i64: 8, 16>}, {pipeline_mode = #tpu.pipeline_mode<synchronous>, transform_indices = @transform_1, window_bounds = array<i64: 16, 128>}, {pipeline_mode = #tpu.pipeline_mode<synchronous>, transform_indices = @transform_2, window_bounds = array<i64: 1, 128>}, {pipeline_mode = #tpu.pipeline_mode<synchronous>, transform_indices = @transform_3, window_bounds = array<i64: 128, 4>}, {pipeline_mode = #tpu.pipeline_mode<synchronous>, transform_indices = @transform_4, window_bounds = array<i64: 1, 4>}, {transform_indices = @transform_5, window_bounds = array<i64: 8, 4>}]} {
    %c0 = arith.constant 0 : index
    %c0_0 = arith.constant 0 : index
    %0 = vector.load %arg1[%c0, %c0_0] : memref<8x16xf32, #tpu.memory_space<vmem>>, vector<8x16xf32>
    %c0_1 = arith.constant 0 : index
    %c0_2 = arith.constant 0 : index
    %1 = vector.load %arg2[%c0_1, %c0_2] : memref<16x128xf32, #tpu.memory_space<vmem>>, vector<16x128xf32>
    %cst = arith.constant dense<0.000000e+00> : vector<8x128xf32>
    %2 = tpu.matmul %0, %1, %cst {dimension_numbers = #tpu.dot_dimension_numbers<[1], [0], [0], [1], [0, 0, 1, 1], [], []>} : vector<8x16xf32>, vector<16x128xf32>, vector<8x128xf32> -> vector<8x128xf32>
    %c0_3 = arith.constant 0 : index
    %c0_4 = arith.constant 0 : index
    %3 = vector.load %arg3[%c0_3, %c0_4] : memref<1x128xf32, #tpu.memory_space<vmem>>, vector<1x128xf32>
    %4 = vector.broadcast %3 : vector<1x128xf32> to vector<8x128xf32>
    %5 = arith.addf %2, %4 : vector<8x128xf32>
    %6 = math.tanh %5 : vector<8x128xf32>
    %c0_5 = arith.constant 0 : index
    %c0_6 = arith.constant 0 : index
    %7 = vector.load %arg4[%c0_5, %c0_6] : memref<128x4xf32, #tpu.memory_space<vmem>>, vector<128x4xf32>
    %cst_7 = arith.constant dense<0.000000e+00> : vector<8x4xf32>
    %8 = tpu.matmul %6, %7, %cst_7 {dimension_numbers = #tpu.dot_dimension_numbers<[1], [0], [0], [1], [0, 0, 1, 1], [], []>} : vector<8x128xf32>, vector<128x4xf32>, vector<8x4xf32> -> vector<8x4xf32>
    %c0_8 = arith.constant 0 : index
    %c0_9 = arith.constant 0 : index
    %9 = vector.load %arg5[%c0_8, %c0_9] : memref<1x4xf32, #tpu.memory_space<vmem>>, vector<1x4xf32>
    %10 = vector.broadcast %9 : vector<1x4xf32> to vector<8x4xf32>
    %11 = arith.addf %8, %10 : vector<8x4xf32>
    %c0_10 = arith.constant 0 : index
    %c0_11 = arith.constant 0 : index
    %12 = vector.load %arg6[%c0_10, %c0_11] : memref<8x4xf32, #tpu.memory_space<vmem>>, vector<8x4xf32>
    tpu.vector_store %arg6[%c0_10, %c0_11], %11 {strides = array<i32>} : memref<8x4xf32, #tpu.memory_space<vmem>>, vector<8x4xf32>,
    return
  }
  func.func @transform_0(%arg0: i32) -> (i32, i32) {
    %c0_i32 = arith.constant 0 : i32
    %c0_i32_0 = arith.constant 0 : i32
    return %arg0, %c0_i32 : i32, i32
  }
  func.func @transform_1(%arg0: i32) -> (i32, i32) {
    %c0_i32 = arith.constant 0 : i32
    %c0_i32_0 = arith.constant 0 : i32
    %c0_i32_1 = arith.constant 0 : i32
    return %c0_i32, %c0_i32_0 : i32, i32
  }
  func.func @transform_2(%arg0: i32) -> (i32, i32) {
    %c0_i32 = arith.constant 0 : i32
    %c0_i32_0 = arith.constant 0 : i32
    %c0_i32_1 = arith.constant 0 : i32
    return %c0_i32, %c0_i32_0 : i32, i32
  }
  func.func @transform_3(%arg0: i32) -> (i32, i32) {
    %c0_i32 = arith.constant 0 : i32
    %c0_i32_0 = arith.constant 0 : i32
    %c0_i32_1 = arith.constant 0 : i32
    return %c0_i32, %c0_i32_0 : i32, i32
  }
  func.func @transform_4(%arg0: i32) -> (i32, i32) {
    %c0_i32 = arith.constant 0 : i32
    %c0_i32_0 = arith.constant 0 : i32
    %c0_i32_1 = arith.constant 0 : i32
    return %c0_i32, %c0_i32_0 : i32, i32
  }
  func.func @transform_5(%arg0: i32) -> (i32, i32) {
    %c0_i32 = arith.constant 0 : i32
    %c0_i32_0 = arith.constant 0 : i32
    return %arg0, %c0_i32 : i32, i32
  }
}

</mosaic_0001>

<bundles_post_ra>
// kernel: qnn_forward.1
= control target key start
LH: loop header
LB: loop body
LE: loop exit
PB: predicated region body
PF: predicated region fallthrough
CT: control target
= control target key end

     0   :  { %v301_v0 = vmov 0.0|0.0   ;;  %vm302_vm0 = vmmov 0   ;;  %v303_v3 = vmov 0.0   ;;  %vm30_vm1 = vcmask 130048   ;;  %s400_s1 = inlined_call_operand.vmem [shape: f32[16,128], index: 1, kind: input, shape index: {}]   ;;  %s401_s3 = inlined_call_operand.vmem [shape: f32[128,4], index: 3, kind: input, shape index: {}]   ;;  %s402_s0 = inlined_call_operand.vmem [shape: f32[8,16], index: 0, kind: input, shape index: {}]   ;;  %s403_s2 = inlined_call_operand.vmem [shape: f32[1,128], index: 2, kind: input, shape index: {}]   ;;  %s404_s4 = inlined_call_operand.vmem [shape: f32[1,4], index: 4, kind: input, shape index: {}]   ;;  %s405_s5 = inlined_call_operand.vmem [shape: f32[8,4], index: 5, kind: output, shape index: {}]  }
   0x1   :  { %269 = vmatprep.subr.bf16.mxu0 %v301_v0  ;;  %v21_v1 = vld [vmem:[%s400_s1] sm:$0xff]  ;;  %v22_v2 = vld [vmem:[%s400_s1 + $0x8] sm:$0xff]  ;;  %231 = vmatprep.mubr.msk.f32.mxu0 %vm302_vm0, %v303_v3  ;;  %v107_v7 = vld [vmem:[%s401_s3 + $0x10] sm:$0xff]  ;;  %vm198_vm2 = vcmask 31744  }
   0x2   :  { %v270_v4 = vpack.c.bf16 %v22_v2, %v21_v1  ;;  %272 = vmatprep.subr.bf16.mxu1 %v301_v0  ;;  %v105_v5 = vld [vmem:[%s401_s3] sm:$0xff]  ;;  %v106_v6 = vld [vmem:[%s401_s3 + $0x8] sm:$0xff]  ;;  %266 = vmatprep.mubr.msk.f32.mxu1 %vm302_vm0, %v303_v3  ;;  %v108_v9 = vld [vmem:[%s401_s3 + $0x18] sm:$0xff] }
   0x3   :  { %v273_v8 = vpack.c.bf16 %v106_v6, %v105_v5  ;;  %v20_v10 = vld [vmem:[%s402_s0] sm:$0xff]  ;;  %v276_v11 = vpack.c.bf16 %v108_v9, %v107_v7  ;;  %v110_v13 = vld [vmem:[%s401_s3 + $0x28] sm:$0xff]  ;;  %v111_v15 = vld [vmem:[%s401_s3 + $0x30] sm:$0xff] }
   0x4   :  { %271 = vmatpush3.bf16.msra.mxu0 %v270_v4  ;;  %v109_v12 = vld [vmem:[%s401_s3 + $0x20] sm:$0xff]  ;;  %v112_v16 = vld [vmem:[%s401_s3 + $0x38] sm:$0xff]  ;;  %v114_v19 = vld [vmem:[%s401_s3 + $0x48] sm:$0xff] }
   0x5   :  { %274 = vmatpush3.bf16.msra.mxu1 %v273_v8  ;;  %v279_v14 = vpack.c.bf16 %v110_v13, %v109_v12  ;;  %v282_v17 = vpack.c.bf16 %v112_v16, %v111_v15  ;;  %v113_v18 = vld [vmem:[%s401_s3 + $0x40] sm:$0xff]  ;;  %v115_v21 = vld [vmem:[%s401_s3 + $0x50] sm:$0xff]  ;;  %v116_v22 = vld [vmem:[%s401_s3 + $0x58] sm:$0xff] }
   0x6   :  { %275 = vmatprep.subr.bf16.mxu1 %v301_v0  ;;  %v285_v20 = vpack.c.bf16 %v114_v19, %v113_v18  ;;  %v288_v23 = vpack.c.bf16 %v116_v22, %v115_v21  ;;  %v117_v24 = vld [vmem:[%s401_s3 + $0x60] sm:$0xff]  ;;  %v118_v25 = vld [vmem:[%s401_s3 + $0x68] sm:$0xff]  ;;  %v119_v27 = vld [vmem:[%s401_s3 + $0x70] sm:$0xff] }
   0x7   :  { %232 = vmatmul.mubr.msk.f32.vlgmr.msra.gmra.mrb[0].mxu0 %vm30_vm1, %v20_v10  ;;  %v291_v26 = vpack.c.bf16 %v118_v25, %v117_v24  ;;  %v120_v28 = vld [vmem:[%s401_s3 + $0x78] sm:$0xff]  ;;  %v204_v30 = vld [vmem:[%s403_s2] ss:$0 sm:$0xff] }
   0x8   :  { %v294_v29 = vpack.c.bf16 %v120_v28, %v119_v27  ;;  %v206_v35 = vld [vmem:[%s404_s4] ss:$0 sm:$0xff] }
   0x9   :  { %277 = vmatpush3.bf16.msra.mxu1 %v276_v11 }
   0xa   :  { %278 = vmatprep.subr.bf16.mxu1 %v301_v0 }
   0xd   :  { %280 = vmatpush3.bf16.msra.mxu1 %v279_v14 }
   0xe   :  { %281 = vmatprep.subr.bf16.mxu1 %v301_v0 }
  0x11   :  { %283 = vmatpush3.bf16.msra.mxu1 %v282_v17 }
  0x12   :  { %284 = vmatprep.subr.bf16.mxu1 %v301_v0 }
  0x15   :  { %286 = vmatpush3.bf16.msra.mxu1 %v285_v20 }
  0x16   :  { %287 = vmatprep.subr.bf16.mxu1 %v301_v0 }
  0x19   :  { %289 = vmatpush3.bf16.msra.mxu1 %v288_v23 }
  0x1a   :  { %290 = vmatprep.subr.bf16.mxu1 %v301_v0 }
  0x1d   :  { %292 = vmatpush3.bf16.msra.mxu1 %v291_v26 }
  0x1e   :  { %293 = vmatprep.subr.bf16.mxu1 %v301_v0 }
  0x21   :  { %295 = vmatpush3.bf16.msra.mxu1 %v294_v29 }
  0xda   :  { %v100_v31 = vpop.f32.mrb[0].mxu0 }
  0xdb   :  { %v101_v32 = vadd.f32 %v204_v30, %v100_v31  ;;  %v233_v33 = vpop.f32.mrb[1].mxu0 }
  0xdd   :  { %299 = vtanh.f32 %v101_v32 }
  0xe7   :  { %v300_v34 = vpop.eup %299 }
  0xe8   :  { %267 = vmatmul.mubr.f32.vlgmr.msra.gmra.mrb[0].mxu1 %v300_v34 }
 0x1bb   :  { %v194_v36 = vpop.f32.mrb[0].mxu1 }
 0x1bc   :  { %v195_v37 = vadd.f32 %v206_v35, %v194_v36  ;;  %v268_v38 = vpop.f32.mrb[1].mxu1 }
 0x1be   :  { %199 = vst.msk [vmem:[%s405_s5] sm:$0xff] %vm198_vm2, %v195_v37 }

</bundles_post_ra>
